<compile_context>
chip_gen: v7x
topology: tpu7x:2x2x1
jax: 0.10.0
libtpu: 0.0.40
codegen_flags: <defaults>
</compile_context>

<pallas_src>
import functools

import jax
import jax.numpy as jnp
from jax.experimental import pallas as pl
from jax.experimental.pallas import tpu as pltpu


def _dp_linear_fullk_kernel(x_ref, w_ref, b_ref, o_ref):
    """Full-K Linear tile: one MXU matmul, bias add, store.

    Used both for the single-step small-problem path (full arrays in VMEM)
    and for the (i, j)-tiled path where the replicated weight strip stays
    VMEM-resident across the whole K reduction.

    x_ref: (tm, Kp) bf16   w_ref: (Kp, tn) bf16
    b_ref: (1,  tn) f32    o_ref: (tm, tn) f32
    """
    o_ref[...] = (
        jnp.dot(x_ref[...], w_ref[...], preferred_element_type=jnp.float32)
        + b_ref[...]
    ).astype(o_ref.dtype)


def _dp_linear_ktiled_kernel(x_ref, w_ref, b_ref, o_ref, acc_ref):
    """K-tiled fallback for very large H: f32 VMEM accumulator over the K grid
    axis (must stay last / "arbitrary"), bias folded into the k==0 init."""
    k = pl.program_id(2)

    @pl.when(k == 0)
    def _():
        acc_ref[...] = jnp.broadcast_to(b_ref[...], acc_ref.shape)

    acc_ref[...] += jnp.dot(
        x_ref[...], w_ref[...], preferred_element_type=jnp.float32
    )

    @pl.when(k == pl.num_programs(2) - 1)
    def _():
        o_ref[...] = acc_ref[...].astype(o_ref.dtype)


def _round_up(x, m):
    return (x + m - 1) // m * m


# Whole-problem-in-VMEM threshold for the single-step path.
_SMALL_VMEM_BYTES = 4 * 1024 * 1024
# Per-step budget for keeping the full-K weight strip resident (stays well
# under the 32 MiB scoped-VMEM default, which also holds on v7x's 64 MiB).
_FULLK_VMEM_BYTES = 20 * 1024 * 1024


@functools.partial(jax.jit, static_argnames=("tm", "tn", "tk"))
def my_data_parallel_forward(x_shards, weight, bias, *, tm=512, tn=512, tk=512):
    """Apply the single replicated Linear module to each input shard.

    x_shards: (D, B, H) float32 -- one slice per simulated device.
    weight:   (H, O)    float32 -- single parameter set (replicated).
    bias:     (1, O)    float32
    Returns the stacked (D, B, O) float32 output; out[d] is the per-"device"
    output that DataParallel.parallel_apply would have returned for shard d.
    """
    D, B, H = x_shards.shape
    O = weight.shape[1]
    M = D * B

    # Collapse the shard axis into M; cast operands for the bf16 MXU path
    # (f32 accumulation).  TODO(synk): a bit-exact f32 torch.nn.Linear would
    # need the f32 multi-pass MXU path instead of bf16 operands.
    x_c = x_shards.reshape(M, H).astype(jnp.bfloat16)
    w_c = weight.astype(jnp.bfloat16)
    b_c = bias.reshape(1, O).astype(jnp.float32)

    # ---------- Path A: whole problem fits in VMEM -> one step, no padding.
    small_bytes = (M * H + H * O) * 2 + (O + M * O) * 4
    if small_bytes <= _SMALL_VMEM_BYTES:
        out = pl.pallas_call(
            _dp_linear_fullk_kernel,
            out_shape=jax.ShapeDtypeStruct((M, O), jnp.float32),
            in_specs=[pl.BlockSpec(memory_space=pltpu.MemorySpace.VMEM)] * 3,
            out_specs=pl.BlockSpec(memory_space=pltpu.MemorySpace.VMEM),
        )(x_c, w_c, b_c)
        return out.reshape(D, B, O)

    # ---------- Path B: tiled matmul with replicated-weight residency.
    # Clamp tiles to the (aligned) problem: sublane dims need 8-multiples,
    # lane dims need 128-multiples.
    tm_e = min(tm, _round_up(M, 8))
    tk_e = min(tk, _round_up(H, 128))
    tn_e = min(tn, _round_up(O, 128))

    Mp = _round_up(M, tm_e)
    Kp = _round_up(H, tk_e)
    Np = _round_up(O, tn_e)

    # Only pad dimensions that are actually ragged (K padding is zero, so the
    # reduction stays exact; padded rows/cols are sliced off at the end).
    if (Mp, Kp) != (M, H):
        x_c = jnp.pad(x_c, ((0, Mp - M), (0, Kp - H)))
    if (Kp, Np) != (H, O):
        w_c = jnp.pad(w_c, ((0, Kp - H), (0, Np - O)))
    if Np != O:
        b_c = jnp.pad(b_c, ((0, 0), (0, Np - O)))

    # Double-buffered inputs + output (+ slack) for a full-K resident step.
    fullk_bytes = 2 * (tm_e * Kp + Kp * tn_e) * 2 + 3 * tm_e * tn_e * 4

    if fullk_bytes <= _FULLK_VMEM_BYTES:
        # 2D grid: x row strip fetched once per i, replicated weight strip
        # resident across the whole K reduction; no per-k weight re-DMA and
        # no accumulator scratch.  Both axes "parallel" -> v7x megacore.
        grid = (Mp // tm_e, Np // tn_e)
        out_p = pl.pallas_call(
            _dp_linear_fullk_kernel,
            out_shape=jax.ShapeDtypeStruct((Mp, Np), jnp.float32),
            grid_spec=pltpu.PrefetchScalarGridSpec(
                num_scalar_prefetch=0,
                grid=grid,
                in_specs=[
                    pl.BlockSpec((tm_e, Kp), lambda i, j: (i, 0)),   # activations
                    pl.BlockSpec((Kp, tn_e), lambda i, j: (0, j)),   # replicated weight
                    pl.BlockSpec((1, tn_e), lambda i, j: (0, j)),    # replicated bias
                ],
                out_specs=pl.BlockSpec((tm_e, tn_e), lambda i, j: (i, j)),
            ),
            compiler_params=pltpu.CompilerParams(
                dimension_semantics=("parallel", "parallel"),
            ),
        )(x_c, w_c, b_c)
    else:
        # Very large H: classic M/N/K tiling with f32 accumulator; K must be
        # the last ("arbitrary") grid axis for the accumulator to be correct.
        grid = (Mp // tm_e, Np // tn_e, Kp // tk_e)
        out_p = pl.pallas_call(
            _dp_linear_ktiled_kernel,
            out_shape=jax.ShapeDtypeStruct((Mp, Np), jnp.float32),
            grid_spec=pltpu.PrefetchScalarGridSpec(
                num_scalar_prefetch=0,
                grid=grid,
                in_specs=[
                    pl.BlockSpec((tm_e, tk_e), lambda i, j, k: (i, k)),
                    pl.BlockSpec((tk_e, tn_e), lambda i, j, k: (k, j)),
                    pl.BlockSpec((1, tn_e), lambda i, j, k: (0, j)),
                ],
                out_specs=pl.BlockSpec((tm_e, tn_e), lambda i, j, k: (i, j)),
                scratch_shapes=[pltpu.VMEM((tm_e, tn_e), jnp.float32)],
            ),
            compiler_params=pltpu.CompilerParams(
                dimension_semantics=("parallel", "parallel", "arbitrary"),
            ),
        )(x_c, w_c, b_c)

    if (Mp, Np) != (M, O):
        out_p = out_p[:M, :O]
    return out_p.reshape(D, B, O)


def _reference(x_shards, weight, bias):
    """bf16-operand / f32-accumulate reference (matches the MXU path)."""
    x_r = x_shards.astype(jnp.bfloat16).astype(jnp.float32)
    w_r = weight.astype(jnp.bfloat16).astype(jnp.float32)
    return jnp.einsum("dbh,ho->dbo", x_r, w_r) + bias.reshape(1, 1, -1)


if __name__ == "__main__":
    key = jax.random.PRNGKey(0)

    # ---- Demo shapes (DataParallel over 2 simulated devices): small path.
    D, B, H, O = 2, 8, 32, 32
    kx, kw, kb, kx2, kw2, kb2 = jax.random.split(key, 6)

    x_shards = jax.random.normal(kx, (D, B, H), dtype=jnp.float32)
    weight = jax.random.normal(kw, (H, O), dtype=jnp.float32) * 0.1
    bias = jax.random.normal(kb, (1, O), dtype=jnp.float32) * 0.1

    out = jax.block_until_ready(my_data_parallel_forward(x_shards, weight, bias))
    assert out.shape == (D, B, O)
    ref = _reference(x_shards, weight, bias)
    assert jnp.allclose(out, ref, atol=2e-3, rtol=2e-3)
    ref_f32 = jnp.einsum("dbh,ho->dbo", x_shards, weight) + bias.reshape(1, 1, O)
    assert jnp.allclose(out, ref_f32, atol=5e-2, rtol=5e-2)

    # ---- Moderate shapes: exercises the tiled, weight-resident path
    # (grid (2, 1), no padding / slicing emitted since dims are tile-aligned).
    D2, B2, H2, O2 = 2, 512, 256, 384
    x2 = jax.random.normal(kx2, (D2, B2, H2), dtype=jnp.float32)
    w2 = jax.random.normal(kw2, (H2, O2), dtype=jnp.float32) * 0.05
    b2 = jax.random.normal(kb2, (1, O2), dtype=jnp.float32) * 0.05

    out2 = jax.block_until_ready(my_data_parallel_forward(x2, w2, b2))
    assert out2.shape == (D2, B2, O2)
    ref2 = _reference(x2, w2, b2)
    assert jnp.allclose(out2, ref2, atol=2e-3, rtol=2e-3)

    print("KERNEL_OK")
</pallas_src>

<mosaic_0001>
module attributes {stable_mosaic.version = 11 : i64} {
  func.func @_dp_linear_fullk_kernel(%arg0: memref<16x32xbf16, #tpu.memory_space<vmem>>, %arg1: memref<32x32xbf16, #tpu.memory_space<vmem>>, %arg2: memref<1x32xf32, #tpu.memory_space<vmem>>, %arg3: memref<16x32xf32, #tpu.memory_space<vmem>>) attributes {dimension_semantics = [], scalar_prefetch = 0 : i64, scratch_operands = 0 : i64, tpu.core_type = #tpu.core_type<tc>} {
    %c0 = arith.constant 0 : index
    %c0_0 = arith.constant 0 : index
    %0 = vector.load %arg0[%c0, %c0_0] : memref<16x32xbf16, #tpu.memory_space<vmem>>, vector<16x32xbf16>
    %c0_1 = arith.constant 0 : index
    %c0_2 = arith.constant 0 : index
    %1 = vector.load %arg1[%c0_1, %c0_2] : memref<32x32xbf16, #tpu.memory_space<vmem>>, vector<32x32xbf16>
    %cst = arith.constant dense<0.000000e+00> : vector<16x32xf32>
    %2 = tpu.matmul %0, %1, %cst {dimension_numbers = #tpu.dot_dimension_numbers<[1], [0], [0], [1], [0, 0, 1, 1], [], []>} : vector<16x32xbf16>, vector<32x32xbf16>, vector<16x32xf32> -> vector<16x32xf32>
    %c0_3 = arith.constant 0 : index
    %c0_4 = arith.constant 0 : index
    %3 = vector.load %arg2[%c0_3, %c0_4] : memref<1x32xf32, #tpu.memory_space<vmem>>, vector<1x32xf32>
    %4 = vector.broadcast %3 : vector<1x32xf32> to vector<16x32xf32>
    %5 = arith.addf %2, %4 : vector<16x32xf32>
    %c0_5 = arith.constant 0 : index
    %c0_6 = arith.constant 0 : index
    %6 = vector.load %arg3[%c0_5, %c0_6] : memref<16x32xf32, #tpu.memory_space<vmem>>, vector<16x32xf32>
    tpu.vector_store %arg3[%c0_5, %c0_6], %5 {strides = array<i32>} : memref<16x32xf32, #tpu.memory_space<vmem>>, vector<16x32xf32>,
    return
  }
}

</mosaic_0001>

<bundles_post_ra>
// kernel: my_data_parallel_forward.1
= control target key start
LH: loop header
LB: loop body
LE: loop exit
PB: predicated region body
PF: predicated region fallthrough
CT: control target
= control target key end

     0   :  { %v157_v1 = vmov 0.0   ;;  %vm158_vm0 = vmmov 0   ;;  %s206_s0 = inlined_call_operand.vmem [shape: bf16[16,32], index: 0, kind: input, shape index: {}]   ;;  %s207_s1 = inlined_call_operand.vmem [shape: bf16[32,32], index: 1, kind: input, shape index: {}]   ;;  %s208_s2 = inlined_call_operand.vmem [shape: f32[1,32], index: 2, kind: input, shape index: {}]   ;;  %s209_s3 = inlined_call_operand.hbm [shape: f32[16,32], index: 3, kind: output, shape index: {}]  }
   0x1   :  { %v130_v0 = vld [vmem:[%s207_s1] sm:$0xff]   ;;  %117 = vmatprep.subr.bf16.mxu0 %v157_v1  ;;  %v131_v2 = vld [vmem:[%s207_s1 + $0x8] sm:$0xff]   ;;  %121 = vmatprep.mubr.msk.bf16.mxu0 %vm158_vm0, %v157_v1 }
   0x2   :  { %118 = vmatpush3.bf16.msra.mxu0 %v130_v0 }
   0x3   :  { %119 = vmatprep.subr.bf16.mxu0 %v157_v1 }
   0x4   :  { %8 = vsyncpa [#allocation3], 0  ;;  %v132_v3 = vld [vmem:[%s206_s0] sm:$0xff]   ;;  %vm46_vm1 = vcmask 261120   ;;  %s159_s20 = smov [#allocation2]  }
   0x5   :  { %v109_v4 = vld [vmem:[%s208_s2] ss:$0 sm:$0xff]  ;;  %s98_s21 = sshll.u32 %s159_s20, 4  ;;  %s99_s21 = int_to_ptr.vmem [resolvable:$true] %s98_s21 }
   0x6   :  { %120 = vmatpush3.bf16.msra.mxu0 %v131_v2  ;;  %s133_s1 = scalar_lea.vmem %s99_s21, 256  ;;  %p138_p1 = scmp.lt.s32.totalorder %s99_s21, %s99_s21 }
   0x7   :  { %p134_p0 = scmp.ne.s32.totalorder %s99_s21, %s133_s1  ;;  %p139_p2 = scmp.lt.s32.totalorder %s133_s1, %s133_s1 }
   0x9   :  { %122 = vmatmul.mubr.msk.bf16.vlgmr.msra.gmra.mrb[0].mxu0 %vm46_vm1, %v132_v3  ;;  %p140_p3 = por %p139_p2, %p138_p1 }
   0xb   :  { %p141_p4 = pnand %p140_p3, %p134_p0 }
  0xdc   :  { %v84_v5 = vpop.f32.mrb[0].mxu0 }
  0xdd   :  { %v85_v6 = vadd.f32 %v109_v4, %v84_v5  ;;  %v123_v7 = vpop.f32.mrb[1].mxu0 }
  0xde   :  { %v87_v8 = vpop.f32.mrb[2].mxu0 }
  0xdf   :  { %91 = vst.msk [vmem:[#allocation2] sm:$0xff] %vm46_vm1, %v85_v6  ;;  %v88_v9 = vadd.f32 %v109_v4, %v87_v8  ;;  %v124_v10 = vpop.f32.mrb[3].mxu0 }
  0xe1   :  { %92 = vst.msk [vmem:[#allocation2 + $0x8] sm:$0xff] %vm46_vm1, %v88_v9 }
  0xe2   :  { %144 = shalt.err (!%p141_p4)
}
  0xe3   :  { %s145_s22 = scalar_lea.hbm %s209_s3, 256 }
  0xe4   :  { %p146_p5 = scmp.ne.s32.totalorder %s209_s3, %s145_s22  ;;  %p149_p6 = scmp.lt.u32.totalorder %s145_s22, %s209_s3 }
  0xe6   :  { %p151_p7 = pnand %p149_p6, %p146_p5 }
  0xe8   :  { %154 = shalt.err (!%p151_p7)
}
  0xe9   :  { %s160_s27 = smov 128   ;;  %s161_s28 = smov 8  }
  0xea   :  { %104 = dma.vmem_to_hbm [thread:$0]  %s99_s21, 256, %s209_s3, [#allocation3], %s160_s27, %s160_s27, %s161_s28  }
  0xeb   :  { %155 = dma.done.wait [#allocation3], 256  }
  0xec   :  { %156 = vsyncadd [#allocation3], 4294967040 }
  0xed   :  { %108 = vsyncpa [#allocation3], 1 }

</bundles_post_ra>
